<compile_context>
chip_gen: v7x
topology: tpu7x:2x2x1
jax: 0.10.0
libtpu: 0.0.40
codegen_flags: <defaults>
</compile_context>

<pallas_src>
import functools
import math

import jax
import jax.numpy as jnp
from jax.experimental import pallas as pl
from jax.experimental.pallas import tpu as pltpu

LANES = 128          # lane width; hidden/output dims are zero-padded to this
IN_DIM = 8           # required by the module's assert
F_PAD = 16           # 8 input features padded to 16 rows in the bf16 weight slab

# Row offsets of each (padded) weight matrix inside the packed parameter slab.
W0_OFF, W0_ROWS = 0, F_PAD                      # (16, 128)
W1_OFF, W1_ROWS = W0_OFF + W0_ROWS, LANES       # (128, 128)
W2_OFF, W2_ROWS = W1_OFF + W1_ROWS, LANES       # (128, 128)
W_TOTAL_ROWS = W2_OFF + W2_ROWS                 # 272


def _round_up(n, m):
    return ((n + m - 1) // m) * m


def mlp_kernel(x_ref, w_ref, b_ref, o_ref, *, out_dim):
    # x tile: (tb, 8) f32.  Pad features 8 -> 16 in-register (matches the
    # zero-padded rows of W0), cast to bf16 only for the MXU.
    x = x_ref[...]
    x16 = jnp.concatenate([x, jnp.zeros_like(x)], axis=-1).astype(jnp.bfloat16)

    # Static, sublane-aligned slices of the resident bf16 parameter slab.
    w0 = w_ref[pl.ds(W0_OFF, W0_ROWS), :]       # (16, 128)
    w1 = w_ref[pl.ds(W1_OFF, W1_ROWS), :]       # (128, 128)
    w2 = w_ref[pl.ds(W2_OFF, W2_ROWS), :]       # (128, 128)

    b = b_ref[...]                              # (8, 128) f32
    b0 = b[0:1, :]
    b1 = b[1:2, :]
    b2 = b[2:3, :]                              # padded lanes hold -1e30

    # layer 0: linear + relu (f32 accumulation, f32 elementwise)
    h = jnp.dot(x16, w0, preferred_element_type=jnp.float32)
    h = jnp.maximum(h + b0, 0.0)
    # layer 1: linear + relu
    h = jnp.dot(h.astype(jnp.bfloat16), w1, preferred_element_type=jnp.float32)
    h = jnp.maximum(h + b1, 0.0)
    # final layer: linear (padded output lanes get -1e30 from b2)
    logits = jnp.dot(h.astype(jnp.bfloat16), w2,
                     preferred_element_type=jnp.float32) + b2

    # numerically stable softmax over the padded 128-lane logits; padded lanes
    # underflow to exactly 0 via the -1e30 sentinel, then only the first
    # out_dim lanes are stored (narrow, contiguous HBM writeback).
    m = jnp.max(logits, axis=-1, keepdims=True)
    e = jnp.exp(logits - m)
    denom = jnp.sum(e, axis=-1, keepdims=True)
    probs = e / denom                           # exact divide: compute is not the bottleneck
    o_ref[...] = probs[:, :out_dim].astype(o_ref.dtype)


def pack_params(params):
    """Pack per-layer (W_(in,out), b_(out,)) into one bf16 weight slab and one
    f32 bias slab, zero-padded to 128 lanes.  Padded lanes of the final bias
    are set to -1e30 so the in-kernel softmax zeroes them."""
    (w0, b0), (w1, b1), (w2, b2) = params
    in_dim, h0 = w0.shape
    h0b, h1 = w1.shape
    h1b, out_dim = w2.shape
    assert in_dim == IN_DIM, "first layer must accept input size 8"
    assert h0 == h0b and h1 == h1b
    assert max(h0, h1, out_dim) <= LANES

    w0p = jnp.zeros((W0_ROWS, LANES), jnp.float32).at[:in_dim, :h0].set(w0)
    w1p = jnp.zeros((W1_ROWS, LANES), jnp.float32).at[:h0, :h1].set(w1)
    w2p = jnp.zeros((W2_ROWS, LANES), jnp.float32).at[:h1, :out_dim].set(w2)
    w_packed = jnp.concatenate([w0p, w1p, w2p], axis=0).astype(jnp.bfloat16)

    b_packed = jnp.zeros((8, LANES), jnp.float32)
    b_packed = b_packed.at[0, :h0].set(b0)
    b_packed = b_packed.at[1, :h1].set(b1)
    b_packed = b_packed.at[2, :].set(-1e30)     # mask padded output lanes
    b_packed = b_packed.at[2, :out_dim].set(b2)
    return w_packed, b_packed, out_dim


def mlp_forward(x, w_packed, b_packed, out_dim, *, block_rows=4096):
    """x: (B, 8) float32.  Returns softmax probabilities of shape (B, out_dim)."""
    B, in_dim = x.shape
    assert in_dim == IN_DIM
    assert block_rows >= 8 and block_rows % 8 == 0

    # Pad the batch only to a multiple of 8 rows (sublane granularity); the
    # ragged final grid block is handled by Pallas, so no tile-multiple pad.
    padded_b = _round_up(B, 8)
    xp = x if padded_b == B else jnp.zeros((padded_b, in_dim), x.dtype).at[:B].set(x)

    tb = min(block_rows, padded_b)
    # Keep >= 2 grid steps so v7x's two TensorCores both get work from the
    # "parallel" batch axis (harmless on single-core v5e/v6e).
    half = _round_up(pl.cdiv(padded_b, 2), 8)
    if padded_b >= 16 and tb > half:
        tb = half

    grid = (pl.cdiv(padded_b, tb),)

    cost = pl.CostEstimate(
        flops=2 * padded_b * (F_PAD * LANES + 2 * LANES * LANES),
        transcendentals=padded_b * LANES,
        bytes_accessed=(padded_b * in_dim * 4          # x read
                        + padded_b * out_dim * 4       # probs write
                        + W_TOTAL_ROWS * LANES * 2     # bf16 weights
                        + 8 * LANES * 4),              # f32 biases
    )

    out = pl.pallas_call(
        functools.partial(mlp_kernel, out_dim=out_dim),
        out_shape=jax.ShapeDtypeStruct((padded_b, out_dim), jnp.float32),
        grid=grid,
        in_specs=[
            pl.BlockSpec((tb, in_dim), lambda i: (i, 0)),            # x row tile
            pl.BlockSpec((W_TOTAL_ROWS, LANES), lambda i: (0, 0)),   # weights (resident)
            pl.BlockSpec((8, LANES), lambda i: (0, 0)),              # biases (resident)
        ],
        out_specs=pl.BlockSpec((tb, out_dim), lambda i: (i, 0)),     # narrow output
        compiler_params=pltpu.CompilerParams(
            dimension_semantics=("parallel",),
            # Sizing rule: 2*(tb*8*4 + tb*out_dim*4) + ~72 KB params must stay
            # under this; safe up to very large tb even on v7x's 64 MiB VMEM.
            vmem_limit_bytes=32 * 1024 * 1024,
        ),
        cost_estimate=cost,
    )(xp, w_packed, b_packed)

    return out if padded_b == B else out[:B]


def init_linear(key, fan_in, fan_out):
    """Deterministic init mimicking torch.nn.Linear (uniform +-1/sqrt(fan_in)).
    Returns W with shape (fan_in, fan_out) (transposed vs PyTorch) and b (fan_out,)."""
    kw, kb = jax.random.split(key)
    bound = 1.0 / math.sqrt(fan_in)
    w = jax.random.uniform(kw, (fan_in, fan_out), jnp.float32, -bound, bound)
    b = jax.random.uniform(kb, (fan_out,), jnp.float32, -bound, bound)
    return w, b


def reference_forward(x, params):
    h = x
    for w, b in params[:-1]:
        h = jnp.maximum(h @ w + b, 0.0)
    w, b = params[-1]
    return jax.nn.softmax(h @ w + b, axis=-1)


if __name__ == "__main__":
    # Module config: input_size must be 8 per the assert in __init__.
    input_size = 8
    hidden_layers = [32, 32]
    output_size = 4
    batch = 64           # small demo batch; tb is capped to 32 -> 2 grid steps

    key = jax.random.PRNGKey(0)
    kx, k0, k1, k2 = jax.random.split(key, 4)

    x = jax.random.normal(kx, (batch, input_size), jnp.float32)

    params = [
        init_linear(k0, input_size, hidden_layers[0]),
        init_linear(k1, hidden_layers[0], hidden_layers[1]),
        init_linear(k2, hidden_layers[1], output_size),
    ]

    w_packed, b_packed, out_dim = pack_params(params)

    out = mlp_forward(x, w_packed, b_packed, out_dim)
    out = jax.block_until_ready(out)

    # Sanity check against a pure-JAX f32 reference (kernel uses bf16 matmul
    # inputs, so tolerances are loosened accordingly).
    ref = reference_forward(x, params)
    assert out.shape == (batch, output_size)
    assert jnp.allclose(out, ref, atol=2e-2, rtol=2e-2)
    assert jnp.allclose(jnp.sum(out, axis=-1), 1.0, atol=1e-3)

    print("KERNEL_OK")
</pallas_src>

<mosaic_0001>
module attributes {stable_mosaic.version = 11 : i64} {
  func.func @mlp_kernel(%arg0: i32, %arg1: memref<32x8xf32, #tpu.memory_space<vmem>>, %arg2: memref<272x128xbf16, #tpu.memory_space<vmem>>, %arg3: memref<8x128xf32, #tpu.memory_space<vmem>>, %arg4: memref<32x4xf32, #tpu.memory_space<vmem>>) attributes {dimension_semantics = [#tpu.dimension_semantics<parallel>], iteration_bounds = array<i64: 2>, scalar_prefetch = 0 : i64, scratch_operands = 0 : i64, tpu.core_type = #tpu.core_type<tc>, window_params = [{transform_indices = @transform_0, window_bounds = array<i64: 32, 8>}, {pipeline_mode = #tpu.pipeline_mode<synchronous>, transform_indices = @transform_1, window_bounds = array<i64: 272, 128>}, {pipeline_mode = #tpu.pipeline_mode<synchronous>, transform_indices = @transform_2, window_bounds = array<i64: 8, 128>}, {transform_indices = @transform_3, window_bounds = array<i64: 32, 4>}]} {
    %c0 = arith.constant 0 : index
    %c0_0 = arith.constant 0 : index
    %0 = vector.load %arg1[%c0, %c0_0] : memref<32x8xf32, #tpu.memory_space<vmem>>, vector<32x8xf32>
    %cst = arith.constant 0.000000e+00 : f32
    %1 = vector.broadcast %cst : f32 to vector<32x8xf32>
    %2 = tpu.concatenate %0, %1 in 1 : vector<32x8xf32>, vector<32x8xf32> -> vector<32x16xf32>
    %3 = arith.truncf %2 : vector<32x16xf32> to vector<32x16xbf16>
    %c0_1 = arith.constant 0 : index
    %c0_2 = arith.constant 0 : index
    %4 = vector.load %arg2[%c0_1, %c0_2] : memref<272x128xbf16, #tpu.memory_space<vmem>>, vector<16x128xbf16>
    %c16 = arith.constant 16 : index
    %c0_3 = arith.constant 0 : index
    %5 = vector.load %arg2[%c16, %c0_3] : memref<272x128xbf16, #tpu.memory_space<vmem>>, vector<128x128xbf16>
    %c144 = arith.constant 144 : index
    %c0_4 = arith.constant 0 : index
    %6 = vector.load %arg2[%c144, %c0_4] : memref<272x128xbf16, #tpu.memory_space<vmem>>, vector<128x128xbf16>
    %c0_5 = arith.constant 0 : index
    %c0_6 = arith.constant 0 : index
    %7 = vector.load %arg3[%c0_5, %c0_6] : memref<8x128xf32, #tpu.memory_space<vmem>>, vector<8x128xf32>
    %8 = vector.extract_strided_slice %7 {offsets = [0, 0], sizes = [1, 128], strides = [1, 1]} : vector<8x128xf32> to vector<1x128xf32>
    %9 = vector.extract_strided_slice %7 {offsets = [1, 0], sizes = [1, 128], strides = [1, 1]} : vector<8x128xf32> to vector<1x128xf32>
    %10 = vector.extract_strided_slice %7 {offsets = [2, 0], sizes = [1, 128], strides = [1, 1]} : vector<8x128xf32> to vector<1x128xf32>
    %cst_7 = arith.constant dense<0.000000e+00> : vector<32x128xf32>
    %11 = tpu.matmul %3, %4, %cst_7 {dimension_numbers = #tpu.dot_dimension_numbers<[1], [0], [0], [1], [0, 0, 1, 1], [], []>} : vector<32x16xbf16>, vector<16x128xbf16>, vector<32x128xf32> -> vector<32x128xf32>
    %12 = vector.broadcast %8 : vector<1x128xf32> to vector<32x128xf32>
    %13 = arith.addf %11, %12 : vector<32x128xf32>
    %cst_8 = arith.constant 0.000000e+00 : f32
    %14 = vector.broadcast %cst_8 : f32 to vector<32x128xf32>
    %15 = arith.maximumf %13, %14 : vector<32x128xf32>
    %16 = arith.truncf %15 : vector<32x128xf32> to vector<32x128xbf16>
    %cst_9 = arith.constant dense<0.000000e+00> : vector<32x128xf32>
    %17 = tpu.matmul %16, %5, %cst_9 {dimension_numbers = #tpu.dot_dimension_numbers<[1], [0], [0], [1], [0, 0, 1, 1], [], []>} : vector<32x128xbf16>, vector<128x128xbf16>, vector<32x128xf32> -> vector<32x128xf32>
    %18 = vector.broadcast %9 : vector<1x128xf32> to vector<32x128xf32>
    %19 = arith.addf %17, %18 : vector<32x128xf32>
    %cst_10 = arith.constant 0.000000e+00 : f32
    %20 = vector.broadcast %cst_10 : f32 to vector<32x128xf32>
    %21 = arith.maximumf %19, %20 : vector<32x128xf32>
    %22 = arith.truncf %21 : vector<32x128xf32> to vector<32x128xbf16>
    %cst_11 = arith.constant dense<0.000000e+00> : vector<32x128xf32>
    %23 = tpu.matmul %22, %6, %cst_11 {dimension_numbers = #tpu.dot_dimension_numbers<[1], [0], [0], [1], [0, 0, 1, 1], [], []>} : vector<32x128xbf16>, vector<128x128xbf16>, vector<32x128xf32> -> vector<32x128xf32>
    %24 = vector.broadcast %10 : vector<1x128xf32> to vector<32x128xf32>
    %25 = arith.addf %23, %24 : vector<32x128xf32>
    %cst_12 = arith.constant dense<0xFF800000> : vector<32xf32>
    %26 = vector.multi_reduction <maximumf>, %25, %cst_12 [1] : vector<32x128xf32> to vector<32xf32>
    %27 = vector.shape_cast %26 : vector<32xf32> to vector<32x1xf32>
    %28 = vector.broadcast %27 : vector<32x1xf32> to vector<32x128xf32>
    %29 = arith.subf %25, %28 : vector<32x128xf32>
    %30 = math.exp %29 : vector<32x128xf32>
    %cst_13 = arith.constant dense<0.000000e+00> : vector<32xf32>
    %31 = vector.multi_reduction <add>, %30, %cst_13 [1] : vector<32x128xf32> to vector<32xf32>
    %32 = vector.shape_cast %31 : vector<32xf32> to vector<32x1xf32>
    %33 = vector.broadcast %32 : vector<32x1xf32> to vector<32x128xf32>
    %34 = arith.divf %30, %33 : vector<32x128xf32>
    %35 = vector.extract_strided_slice %34 {offsets = [0, 0], sizes = [32, 4], strides = [1, 1]} : vector<32x128xf32> to vector<32x4xf32>
    %c0_14 = arith.constant 0 : index
    %c0_15 = arith.constant 0 : index
    %36 = vector.load %arg4[%c0_14, %c0_15] : memref<32x4xf32, #tpu.memory_space<vmem>>, vector<32x4xf32>
    tpu.vector_store %arg4[%c0_14, %c0_15], %35 {strides = array<i32>} : memref<32x4xf32, #tpu.memory_space<vmem>>, vector<32x4xf32>,
    return
  }
  func.func @transform_0(%arg0: i32) -> (i32, i32) {
    %c0_i32 = arith.constant 0 : i32
    %c0_i32_0 = arith.constant 0 : i32
    return %arg0, %c0_i32 : i32, i32
  }
  func.func @transform_1(%arg0: i32) -> (i32, i32) {
    %c0_i32 = arith.constant 0 : i32
    %c0_i32_0 = arith.constant 0 : i32
    %c0_i32_1 = arith.constant 0 : i32
    return %c0_i32, %c0_i32_0 : i32, i32
  }
  func.func @transform_2(%arg0: i32) -> (i32, i32) {
    %c0_i32 = arith.constant 0 : i32
    %c0_i32_0 = arith.constant 0 : i32
    %c0_i32_1 = arith.constant 0 : i32
    return %c0_i32, %c0_i32_0 : i32, i32
  }
  func.func @transform_3(%arg0: i32) -> (i32, i32) {
    %c0_i32 = arith.constant 0 : i32
    %c0_i32_0 = arith.constant 0 : i32
    return %arg0, %c0_i32 : i32, i32
  }
}

</mosaic_0001>

<bundles_post_ra>
// kernel: tpu_custom_call.1
= control target key start
LH: loop header
LB: loop body
LE: loop exit
PB: predicated region body
PF: predicated region fallthrough
CT: control target
= control target key end

     0   :  { %8 = vsyncpa [#allocation3], 0  ;;  %s843_s12 = smov 0   ;;  %s912_s0 = inlined_call_operand.vmem [shape: f32[64,8], index: 0, kind: input, shape index: {}]   ;;  %s913_s1 = inlined_call_operand.hbm [shape: bf16[272,128], index: 1, kind: input, shape index: {}]   ;;  %s914_s2 = inlined_call_operand.vmem [shape: f32[8,128], index: 2, kind: input, shape index: {}]   ;;  %s915_s3 = inlined_call_operand.vmem [shape: f32[64,4], index: 3, kind: output, shape index: {}]  }
   0x1 LB: > { %s625_s13 = sadd.s32 4294967295, %s818_s12   ;;  %p627_p0 = scmp.ge.s32.totalorder %s818_s12, 1  ;;  %s818_s12 = sphi %s843_s12, %s14_s12  }
   0x2   : > { %p113_p1 = scmp.lt.s32.totalorder %s818_s12, 3  ;;  %s820_s14 = smov [#allocation2]  }
   0x3   : > { %s125_s15 = sshll.u32 %s820_s14, 4  ;;  %p857_p3 = scmp.eq.s32.totalorder %s625_s13, 0  ;;  %s126_s15 = int_to_ptr.vmem [resolvable:$true] %s125_s15 }
   0x4   : > { %p851_p2 = pnand %p627_p0, %p113_p1  ;;  %s780_s21 = scalar_lea.hbm %s913_s1, 2176 }
   0x5   : > { %s920_s17 = scalar_select %p857_p3, 1, 0 }
   0x6   : > { %s919_s16 = scalar_select %p851_p2, 1, 0 }
   0x7   : > { %p730_p4 = pneg %p851_p2  ;;  %p781_p6 = scmp.ne.s32.totalorder %s913_s1, %s780_s21 }
   0x8   : > { %p787_p10 = scmp.lt.u32.totalorder %s780_s21, %s913_s1 }
   0x9   : > { %p865_p5 = pnand %p857_p3, %p730_p4 }
   0xb   : > { %p782_p7 = pneg %p865_p5 }
   0xd   : > { %p783_p8 = pnand %p782_p7, %p781_p6 }
   0xf   : > { %p784_p9 = pneg %p783_p8 }
  0x11   : > { %p789_p11 = pnand %p787_p10, %p784_p9 }
  0x13   : > { %792 = shalt.err (!%p789_p11)
}
  0x14   : > { %s793_s26 = scalar_lea.vmem %s126_s15, 2176  ;;  %p801_p1 = scmp.lt.s32.totalorder %s126_s15, %s126_s15 }
  0x15   : > { %p794_p12 = scmp.ne.s32.totalorder %s126_s15, %s793_s26  ;;  %p802_p4 = scmp.lt.s32.totalorder %s793_s26, %s793_s26 }
  0x17   : > { %p796_p13 = pnand %p794_p12, %p782_p7  ;;  %p803_p3 = por %p802_p4, %p801_p1 }
  0x19   : > { %p797_p0 = pneg %p796_p13 }
  0x1b   : > { %p804_p2 = pnand %p803_p3, %p797_p0 }
  0x1d   : > { %807 = shalt.err (!%p804_p2)
}
  0x1e   : > { %s821_s27 = smov 64   ;;  %s822_s28 = smov 4  }
  0x1f   : > { %733 = dma.hbm_to_vmem [thread:$0]  (!%p865_p5), %s913_s1, 2176, %s126_s15, [#allocation3], %s821_s27, %s821_s27, %s822_s28  }
  0x20   : > { %p922_p6 = scmp.ne.s32.totalorder %s919_s16, 0 }
  0x21   : > { %p923_p8 = scmp.ne.s32.totalorder (!%p922_p6), %s920_s17, 0 }
  0x22   : > { %153 = sbr.rel (%p922_p6) target bundleno = 1033 (0x409), region = 32 }
  0x29   : > { %813 = dma.done.wait (%p923_p8), [#allocation3], 2176  }
  0x2a   : > { %815 = vsyncadd (%p923_p8), [#allocation3], 4294965120  ;;  %s632_s4 = sshll.u32 %s625_s13, 2  ;;  %vm194_vm0 = vcmask 64512   ;;  %v747_v0 = vld [vmem:[#allocation2] sm:$0xff]   ;;  %vm246_vm1 = vcmask 130048   ;;  %v236_v25 = vlaneseq }
  0x2b   : > { %p178_p2 = scmp.lt.s32.totalorder %s632_s4, 7  ;;  %680 = vmatprep.subr.bf16.mxu0 %v747_v0  ;;  %v748_v10 = vld [vmem:[#allocation2 + $0x8] sm:$0xff]   ;;  %v749_v12 = vld [vmem:[#allocation2 + $0x10] sm:$0xff]   ;;  %v750_v13 = vld [vmem:[#allocation2 + $0x18] sm:$0xff]   ;;  %vm552_vm2 = vcmask 31744  }
  0x2c   : > { %681 = vmatpush3.bf16.msra.mxu0 %v747_v0  ;;  %686 = vmatprep.subr.bf16.mxu1 %v748_v10  ;;  %v751_v14 = vld [vmem:[#allocation2 + $0x20] sm:$0xff]   ;;  %v752_v15 = vld [vmem:[#allocation2 + $0x28] sm:$0xff]   ;;  %v753_v16 = vld [vmem:[#allocation2 + $0x30] sm:$0xff]   ;;  %v237_v26 = vshrl.u32 %v236_v25, 7 }
  0x2d   : > { %s925_s4 = smov (!%p178_p2, %s632_s4), 7  ;;  %687 = vmatpush3.bf16.msra.mxu1 %v748_v10  ;;  %v754_v17 = vld [vmem:[#allocation2 + $0x38] sm:$0xff]   ;;  %v755_v18 = vld [vmem:[#allocation2 + $0x40] sm:$0xff]   ;;  %v756_v19 = vld [vmem:[#allocation2 + $0x48] sm:$0xff]  }
  0x2e   : > { %s633_s5 = sshll.u32 %s925_s4, 3  ;;  %688 = vmatprep.subr.bf16.mxu1 %v749_v12  ;;  %v757_v20 = vld [vmem:[#allocation2 + $0x50] sm:$0xff]   ;;  %706 = vmatprep.subr.bf16.mxu0 %v756_v19  ;;  %v758_v21 = vld [vmem:[#allocation2 + $0x58] sm:$0xff]   ;;  %v759_v22 = vld [vmem:[#allocation2 + $0x60] sm:$0xff]   ;;  %v238_v27 = vsub.s32 0, %v237_v26  ;;  %v310_v46 = vsub.s32 1, %v237_v26 }
  0x2f   : > { %s181_s8 = scalar_lea.vmem %s912_s0, %s633_s5  ;;  %v760_v23 = vld [vmem:[#allocation2 + $0x68] sm:$0xff]   ;;  %v761_v24 = vld [vmem:[#allocation2 + $0x70] sm:$0xff]   ;;  %v235_v28 = vld [vmem:[%s914_s2] sm:$0xff]  ;;  %v417_v62 = vsub.s32 2, %v237_v26  ;;  %s187_s14 = scalar_lea.vmem %s915_s3, %s633_s5 }
  0x30   : > { %v190_v1 = vld [vmem:[%s181_s8] sm:$0xff]  ;;  %v191_v2 = vld [vmem:[%s181_s8 + $0x8] sm:$0xff]  ;;  %v192_v3 = vld [vmem:[%s181_s8 + $0x10] sm:$0xff]  ;;  %v239_v29 = vrot.slane %v235_v28, %v238_v27  ;;  %v311_v47 = vrot.slane %v235_v28, %v310_v46 }
  0x31   : > { %v195_v4 = vsel %vm194_vm0, %v190_v1, 0.0  ;;  %v196_v5 = vsel %vm194_vm0, %v191_v2, 0.0  ;;  %v193_v6 = vld [vmem:[%s181_s8 + $0x18] sm:$0xff]  ;;  %v197_v7 = vsel %vm194_vm0, %v192_v3, 0.0  ;;  %689 = vmatpush3.bf16.msra.mxu1 %v749_v12  ;;  %v763_v45 = vld [vmem:[#allocation2 + $0x80] sm:$0xff]   ;;  %v418_v63 = vrot.slane %v235_v28, %v417_v62 }
  0x32   : > { %v199_v8 = vpack.c.bf16 %v196_v5, %v195_v4  ;;  %v198_v9 = vsel %vm194_vm0, %v193_v6, 0.0  ;;  %690 = vmatprep.subr.bf16.mxu1 %v750_v13  ;;  %v762_v44 = vld [vmem:[#allocation2 + $0x78] sm:$0xff]  }
  0x33   : > { %v200_v11 = vpack.c.bf16 %v198_v9, %v197_v7 }
  0x34   : > { %682 = vmatprep.mubr.msk.bf16.mxu0 %vm246_vm1, %v199_v8 }
  0x35   : > { %683 = vmatmul.mubr.msk.bf16.vlgmr.msra.gmra.mrb[0].mxu0 %vm246_vm1, %v200_v11  ;;  %691 = vmatpush3.bf16.msra.mxu1 %v750_v13 }
  0x36   : > { %692 = vmatprep.subr.bf16.mxu1 %v751_v14  ;;  %707 = vmatpush3.bf16.msra.mxu0 %v756_v19 }
  0x37   : > { %708 = vmatprep.subr.bf16.mxu0 %v757_v20 }
  0x39   : > { %693 = vmatpush3.bf16.msra.mxu1 %v751_v14 }
  0x3a   : > { %694 = vmatprep.subr.bf16.mxu1 %v752_v15  ;;  %709 = vmatpush3.bf16.msra.mxu0 %v757_v20 }
  0x3b   : > { %710 = vmatprep.subr.bf16.mxu0 %v758_v21 }
  0x3d   : > { %695 = vmatpush3.bf16.msra.mxu1 %v752_v15 }
  0x3e   : > { %696 = vmatprep.subr.bf16.mxu1 %v753_v16  ;;  %711 = vmatpush3.bf16.msra.mxu0 %v758_v21 }
  0x3f   : > { %712 = vmatprep.subr.bf16.mxu0 %v759_v22 }
  0x41   : > { %697 = vmatpush3.bf16.msra.mxu1 %v753_v16 }
  0x42   : > { %698 = vmatprep.subr.bf16.mxu1 %v754_v17  ;;  %713 = vmatpush3.bf16.msra.mxu0 %v759_v22 }
  0x43   : > { %714 = vmatprep.subr.bf16.mxu0 %v760_v23 }
  0x45   : > { %699 = vmatpush3.bf16.msra.mxu1 %v754_v17 }
  0x46   : > { %700 = vmatprep.subr.bf16.mxu1 %v755_v18  ;;  %715 = vmatpush3.bf16.msra.mxu0 %v760_v23 }
  0x47   : > { %716 = vmatprep.subr.bf16.mxu0 %v761_v24 }
  0x49   : > { %701 = vmatpush3.bf16.msra.mxu1 %v755_v18 }
  0x4a   : > { %717 = vmatpush3.bf16.msra.mxu0 %v761_v24 }
  0x4b   : > { %718 = vmatprep.subr.bf16.mxu0 %v762_v44 }
  0x4e   : > { %719 = vmatpush3.bf16.msra.mxu0 %v762_v44 }
  0x4f   : > { %720 = vmatprep.subr.bf16.mxu0 %v763_v45 }
  0x52   : > { %721 = vmatpush3.bf16.msra.mxu0 %v763_v45 }
 0x108   : > { %v684_v30 = vpop.f32.mrb[0].mxu0 }
 0x109   : > { %v296_v31 = vadd.f32 %v684_v30, %v239_v29  ;;  %v287_v32 = vpop.f32.mrb[1].mxu0 }
 0x10a   : > { %v288_v33 = vadd.f32 %v287_v32, %v239_v29  ;;  %v685_v34 = vpop.f32.mrb[2].mxu0 }
 0x10b   : > { %v299_v35 = vadd.f32 %v685_v34, %v239_v29  ;;  %v290_v36 = vpop.f32.mrb[3].mxu0  ;;  %v304_v38 = vmax.f32 %v296_v31, 0.0 }
 0x10c   : > { %v291_v37 = vadd.f32 %v290_v36, %v239_v29  ;;  %v302_v40 = vmax.f32 %v288_v33, 0.0 }
 0x10d   : > { %v305_v39 = vmax.f32 %v299_v35, 0.0 }
 0x10e   : > { %v303_v41 = vmax.f32 %v291_v37, 0.0 }
 0x10f   : > { %v307_v42 = vpack.c.bf16 %v305_v39, %v304_v38 }
 0x110   : > { %v306_v43 = vpack.c.bf16 %v303_v41, %v302_v40 }
 0x112   : > { %702 = vmatprep.mubr.bf16.mxu1 %v306_v43 }
 0x113   : > { %703 = vmatmul.mubr.bf16.vlgmr.msra.gmra.mrb[0].mxu1 %v307_v42 }
 0x1e6   : > { %v704_v48 = vpop.f32.mrb[0].mxu1 }
 0x1e7   : > { %v403_v49 = vadd.f32 %v704_v48, %v311_v47  ;;  %v394_v50 = vpop.f32.mrb[1].mxu1 }
 0x1e8   : > { %v395_v51 = vadd.f32 %v394_v50, %v311_v47  ;;  %v705_v52 = vpop.f32.mrb[2].mxu1 }
 0x1e9   : > { %v406_v53 = vadd.f32 %v705_v52, %v311_v47  ;;  %v397_v54 = vpop.f32.mrb[3].mxu1  ;;  %v411_v56 = vmax.f32 %v403_v49, 0.0 }
 0x1ea   : > { %v398_v55 = vadd.f32 %v397_v54, %v311_v47  ;;  %v409_v58 = vmax.f32 %v395_v51, 0.0 }
 0x1eb   : > { %v412_v57 = vmax.f32 %v406_v53, 0.0 }
 0x1ec   : > { %v410_v59 = vmax.f32 %v398_v55, 0.0 }
 0x1ed   : > { %v414_v60 = vpack.c.bf16 %v412_v57, %v411_v56 }
 0x1ee   : > { %v413_v61 = vpack.c.bf16 %v410_v59, %v409_v58 }
 0x1f0   : > { %722 = vmatprep.mubr.bf16.mxu0 %v413_v61 }
 0x1f1   : > { %723 = vmatmul.mubr.bf16.vlgmr.msra.gmra.mrb[4].mxu0 %v414_v60 }
 0x2c4   : > { %v724_v0 = vpop.f32.mrb[4].mxu0 }
 0x2c5   : > { %v510_v1 = vadd.f32 %v724_v0, %v418_v63  ;;  %v501_v2 = vpop.f32.mrb[5].mxu0 }
 0x2c6   : > { %v502_v3 = vadd.f32 %v501_v2, %v418_v63  ;;  %v725_v4 = vpop.f32.mrb[6].mxu0 }
 0x2c7   : > { %520 = vmax.xlane.f32.xlu1 %v510_v1  ;;  %v504_v5 = vpop.f32.mrb[7].mxu0  ;;  %v513_v6 = vadd.f32 %v725_v4, %v418_v63 }
 0x2c8   : > { %516 = vmax.xlane.f32.xlu0 %v502_v3  ;;  %v505_v7 = vadd.f32 %v504_v5, %v418_v63 }
 0x2cb   : > { %522 = vmax.xlane.f32.xlu1 %v513_v6 }
 0x2cc   : > { %518 = vmax.xlane.f32.xlu0 %v505_v7 }
 0x354   : > { %v521_v8 = vpop.xlane.xlu1 %520 }
 0x355   : > { %v526_v9 = vsub.f32 %v510_v1, %v521_v8  ;;  %v517_v10 = vpop.xlane.xlu0 %516 }
 0x356   : > { %v524_v11 = vsub.f32 %v502_v3, %v517_v10 }
 0x357   : > { %v532_v14 = vmul.f32 1.442695, %v526_v9 }
 0x358   : > { %v528_v12 = vmul.f32 1.442695, %v524_v11  ;;  %v523_v13 = vpop.xlane.xlu1 %522 }
 0x359   : > { %v519_v15 = vpop.xlane.xlu0 %518  ;;  %v527_v16 = vsub.f32 %v513_v6, %v523_v13 }
 0x35a   : > { %764 = vpow2.f32 %v528_v12  ;;  %v525_v17 = vsub.f32 %v505_v7, %v519_v15 }
 0x35b   : > { %766 = vpow2.f32 %v532_v14  ;;  %v534_v19 = vmul.f32 1.442695, %v527_v16 }
 0x35c   : > { %v530_v18 = vmul.f32 1.442695, %v525_v17 }
 0x35e   : > { %768 = vpow2.f32 %v530_v18 }
 0x35f   : > { %770 = vpow2.f32 %v534_v19 }
 0x364   : > { %v765_v20 = vpop.eup %764 }
 0x365   : > { %536 = vadd.xlane.f32.xlu0 %v765_v20  ;;  %v767_v21 = vpop.eup %766 }
 0x368   : > { %v769_v22 = vpop.eup %768 }
 0x369   : > { %540 = vadd.xlane.f32.xlu0 %v767_v21  ;;  %538 = vadd.xlane.f32.xlu1 %v769_v22  ;;  %v771_v23 = vpop.eup %770 }
 0x36d   : > { %542 = vadd.xlane.f32.xlu1 %v771_v23 }
 0x3f2   : > { %v537_v24 = vpop.xlane.xlu0 %536 }
 0x3f3   : > { %772 = vrcp.f32 %v537_v24 }
 0x3f6   : > { %v539_v25 = vpop.xlane.xlu1 %538  ;;  %v541_v26 = vpop.xlane.xlu0 %540 }
 0x3f7   : > { %774 = vrcp.f32 %v539_v25 }
 0x3f8   : > { %776 = vrcp.f32 %v541_v26 }
 0x3fa   : > { %v543_v27 = vpop.xlane.xlu1 %542 }
 0x3fb   : > { %778 = vrcp.f32 %v543_v27 }
 0x3fd   : > { %v773_v28 = vpop.eup %772 }
 0x3fe   : > { %v545_v29 = vmul.f32 %v773_v28, %v765_v20 }
 0x400   : > { %553 = vst.msk [vmem:[%s187_s14] sm:$0xff] %vm552_vm2, %v545_v29 }
 0x401   : > { %v775_v30 = vpop.eup %774 }
 0x402   : > { %v777_v31 = vpop.eup %776  ;;  %v547_v32 = vmul.f32 %v775_v30, %v769_v22 }
 0x403   : > { %v549_v33 = vmul.f32 %v777_v31, %v767_v21 }
 0x404   : > { %554 = vst.msk [vmem:[%s187_s14 + $0x8] sm:$0xff] %vm552_vm2, %v547_v32 }
 0x405   : > { %v779_v34 = vpop.eup %778  ;;  %555 = vst.msk [vmem:[%s187_s14 + $0x10] sm:$0xff] %vm552_vm2, %v549_v33 }
 0x406   : > { %v551_v35 = vmul.f32 %v779_v34, %v771_v23 }
 0x408   : > { %556 = vst.msk [vmem:[%s187_s14 + $0x18] sm:$0xff] %vm552_vm2, %v551_v35 }
 0x409 PF: > { %s14_s12 = sadd.s32 1, %s818_s12  }
 0x40a   : > { %p11_p3 = scmp.ge.s32.totalorder %s14_s12, 4  }
 0x40c   :  { %13 = sbr.rel (!%p11_p3) target bundleno = 1 (0x1), region = 67 }
 0x413   :  { %579 = vsyncpa [#allocation3], 1 }
 0x414   :  { %581 = vsyncpa [#allocation3 + $0x1], 1 }

</bundles_post_ra>
